<compile_context>
chip_gen: v5e
topology: v5e:2x2
jax: 0.10.0
libtpu: 0.0.40
codegen_flags: <defaults>
</compile_context>

<pallas_src>
import math

import jax
import jax.numpy as jnp
from jax import lax
from jax.experimental import pallas as pl
from jax.experimental.pallas import tpu as pltpu


def _round_up(v, m):
    return -(-v // m) * m


def _make_adapter_kernel(act_fn):
    """Fused adapter kernel for one row-tile.

    scale_ref : SMEM (1, 1) f32       learned residual scale
    x_ref     : VMEM (tm, dim)        input tile (native dtype)
    wd_ref    : VMEM (dim, adim_p)    down-projection weight (transposed, lane-padded)
    bd_ref    : VMEM (1, adim_p)      down-projection bias (lane-padded)
    wu_ref    : VMEM (adim_p, dim)    up-projection weight (transposed, lane-padded)
    bu_ref    : VMEM (1, dim)         up-projection bias
    o_ref     : VMEM (tm, dim)        output tile
    """

    def kernel(scale_ref, x_ref, wd_ref, bd_ref, wu_ref, bu_ref, o_ref):
        x = x_ref[...]  # keep native dtype (bf16 goes straight to the MXU)

        # down projection: MXU consumes native operands, accumulates in f32
        h = jnp.dot(x, wd_ref[...], preferred_element_type=jnp.float32)
        h = h + bd_ref[...].astype(jnp.float32)

        # activation in f32 on the VPU/EUP
        if act_fn == "gelu":
            # exact erf GELU (matches torch.nn.GELU default)
            inv_sqrt2 = jnp.float32(1.0 / math.sqrt(2.0))
            a = 0.5 * h * (1.0 + lax.erf(h * inv_sqrt2))
        else:  # relu
            a = jnp.maximum(h, 0.0)

        # up projection: feed the MXU in the weight dtype
        a = a.astype(wu_ref.dtype)
        u = jnp.dot(a, wu_ref[...], preferred_element_type=jnp.float32)
        u = u + bu_ref[...].astype(jnp.float32)

        # residual with learned scale, math in f32, cast once on store
        scale = scale_ref[0, 0]
        o_ref[...] = (x.astype(jnp.float32) + scale * u).astype(o_ref.dtype)

    return kernel


def _vmem_capacity_bytes():
    """Per-TensorCore VMEM capacity; conservative 64 MiB (v7x) if unknown."""
    try:
        info = pltpu.get_tpu_info()
        for attr in ("vmem_capacity_bytes", "vmem_bytes", "vmem_capacity"):
            cap = getattr(info, attr, None)
            if cap:
                return int(cap)
    except Exception:
        pass
    return 64 * 1024 * 1024


def adapter_forward(x, w_down, b_down, w_up, b_up, scale, *, act_fn="gelu", tm=1024):
    """x: [..., dim] -> [..., dim]; same semantics as Adapter.forward."""
    dim = x.shape[-1]
    adim = w_down.shape[-1]
    lead = x.shape[:-1]

    x2 = x.reshape(-1, dim)
    n = x2.shape[0]

    # ---- lane-pad the adapter (bottleneck) dim to a multiple of 128 --------
    # Extra columns of w_down / b_down are zero, so the extra lanes of h are
    # exactly 0; GELU(0)=0 and the padded zero rows of w_up contribute nothing.
    # Deliberately NOT padded to 256: the kernel is HBM-bound, so filling the
    # v6e/v7x 256-wide MXU would only double zero-FLOPs and weight bytes.
    adim_p = max(128, _round_up(adim, 128))
    if adim_p != adim:
        pad = adim_p - adim
        w_down = jnp.pad(w_down, ((0, 0), (0, pad)))
        b_down = jnp.pad(b_down, ((0, pad),))
        w_up = jnp.pad(w_up, ((0, pad), (0, 0)))

    # ---- device-aware VMEM budget ------------------------------------------
    vmem_cap = _vmem_capacity_bytes()
    budget = int(0.72 * vmem_cap)          # ~46 MiB on v7x, ~92 MiB on v5e/v6e
    vmem_ceiling = int(0.85 * vmem_cap)    # headroom for Mosaic internal scratch

    bytes_x = x.dtype.itemsize
    bytes_b = b_down.dtype.itemsize

    def _weight_bytes(w_itemsize):
        # weights/biases are grid-invariant and single-buffered (Buffered(1)).
        return 2 * dim * adim_p * w_itemsize + (adim_p + dim) * bytes_b

    weight_bytes = _weight_bytes(w_down.dtype.itemsize)
    if weight_bytes > budget and w_down.dtype == jnp.float32:
        # Graceful fallback for very large dim / f32 weights on small-VMEM
        # parts (v7x): narrow the resident weights to bf16 (numerics trade-off
        # taken only when the f32 weights would not fit the budget).
        w_down = w_down.astype(jnp.bfloat16)
        w_up = w_up.astype(jnp.bfloat16)
        weight_bytes = _weight_bytes(2)
    # TODO(synk): if the weights still exceed the budget (dim >~ 8k on v7x),
    # add an inner grid axis that column-tiles w_up / b_up / the residual
    # instead of collapsing to a tiny row tile.

    bd2 = b_down.reshape(1, adim_p)
    bu2 = b_up.reshape(1, dim)
    scale_arr = jnp.asarray(scale, jnp.float32).reshape(1, 1)

    # ---- pick the row tile: as large as possible within the VMEM budget ----
    # Per-row cost: double-buffered x-in + out tiles, the h/a f32 intermediates
    # on the (padded) adapter dim, plus one dim-wide f32 temp of margin for the
    # bias/residual epilogue (the rest fuses per-vreg).
    per_row = 4 * dim * bytes_x + 8 * adim_p + 4 * dim

    sub = max(8, 32 // bytes_x)            # packed sublanes: 8 f32 / 16 bf16 / 32 int8
    tm_cap = (budget - weight_bytes) // per_row
    tm = int(min(tm, max(sub, tm_cap)))
    tm = max(sub, (tm // sub) * sub)       # sublane-pack aligned
    tm = min(tm, _round_up(n, sub))        # don't exceed (rounded) row count

    # Keep >= 2 row tiles when n is large so megacore parts (v7x: 2 TCs/chip)
    # can shard the "parallel" row axis; negligible cost on single-TC chips.
    if n > 2 * sub and tm >= n:
        tm = max(sub, _round_up(-(-n // 2), sub))

    n_tiles = pl.cdiv(n, tm)               # partial last block handled by Pallas

    vmem_est = int(weight_bytes + tm * per_row)
    vmem_limit = int(min(max(int(1.5 * vmem_est), 32 * 1024 * 1024), vmem_ceiling))

    bytes_w = w_down.dtype.itemsize
    flops = 4 * n * dim * adim_p                                   # 2 matmuls
    transcendentals = n * adim_p if act_fn == "gelu" else 0
    bytes_accessed = (2 * n * dim * bytes_x + 2 * dim * adim_p * bytes_w
                      + (adim_p + dim) * bytes_b)

    kernel = _make_adapter_kernel(act_fn)

    # Grid-invariant blocks: single-buffered so they don't double-charge VMEM.
    single = pl.Buffered(1)

    out = pl.pallas_call(
        kernel,
        out_shape=jax.ShapeDtypeStruct((n, dim), x.dtype),
        grid=(n_tiles,),
        in_specs=[
            pl.BlockSpec(memory_space=pltpu.SMEM),                 # scale (scalar)
            pl.BlockSpec((tm, dim), lambda i: (i, 0)),             # x row tile
            pl.BlockSpec((dim, adim_p), lambda i: (0, 0),          # w_down
                         pipeline_mode=single),
            pl.BlockSpec((1, adim_p), lambda i: (0, 0),            # b_down
                         pipeline_mode=single),
            pl.BlockSpec((adim_p, dim), lambda i: (0, 0),          # w_up
                         pipeline_mode=single),
            pl.BlockSpec((1, dim), lambda i: (0, 0),               # b_up
                         pipeline_mode=single),
        ],
        out_specs=pl.BlockSpec((tm, dim), lambda i: (i, 0)),
        compiler_params=pltpu.CompilerParams(
            dimension_semantics=("parallel",),
            vmem_limit_bytes=vmem_limit),
        cost_estimate=pl.CostEstimate(
            flops=flops,
            transcendentals=transcendentals,
            bytes_accessed=bytes_accessed),
    )(scale_arr, x2, w_down, bd2, w_up, bu2)

    return out.reshape(*lead, dim)


def _reference(x, w_down, b_down, w_up, b_up, scale):
    h = jnp.einsum("...d,da->...a", x.astype(jnp.float32), w_down) + b_down
    a = jax.nn.gelu(h, approximate=False)
    u = jnp.einsum("...a,ad->...d", a, w_up) + b_up
    return (x.astype(jnp.float32) + scale * u).astype(jnp.float32)


if __name__ == "__main__":
    # small shapes consistent with the module: tokens [batch, seq, dim]
    batch, seq, dim, adapter_dim = 2, 8, 32, 8
    init_scale = 0.5

    key = jax.random.PRNGKey(0)
    kx, kwd, kwu, kbu = jax.random.split(key, 4)

    x = jax.random.normal(kx, (batch, seq, dim), dtype=jnp.float32)

    # deterministic synthetic parameter init (module __init__ gives the shapes)
    w_down = jax.random.normal(kwd, (dim, adapter_dim), jnp.float32) * math.sqrt(2.0 / dim)
    b_down = jnp.zeros((adapter_dim,), jnp.float32)
    bound = 1.0 / math.sqrt(adapter_dim)
    w_up = jax.random.uniform(kwu, (adapter_dim, dim), jnp.float32, -bound, bound)
    b_up = jax.random.uniform(kbu, (dim,), jnp.float32, -bound, bound)
    scale = jnp.float32(init_scale)

    # f32 path: must match the erf-GELU reference tightly
    y = adapter_forward(x, w_down, b_down, w_up, b_up, scale)
    y = jax.block_until_ready(y)
    y_ref = _reference(x, w_down, b_down, w_up, b_up, scale)
    assert jnp.allclose(y, y_ref, atol=1e-5, rtol=1e-5), "f32 mismatch vs reference"

    # bf16 path: exercises native-dtype MXU operands (loose tolerance)
    xb = x.astype(jnp.bfloat16)
    yb = adapter_forward(xb,
                         w_down.astype(jnp.bfloat16), b_down.astype(jnp.bfloat16),
                         w_up.astype(jnp.bfloat16), b_up.astype(jnp.bfloat16),
                         scale)
    yb = jax.block_until_ready(yb)
    err = float(jnp.max(jnp.abs(yb.astype(jnp.float32) - y_ref)))
    assert err < 0.1, f"bf16 path mismatch vs reference: max abs err {err}"

    print("KERNEL_OK")
</pallas_src>

<mosaic_0001>
module attributes {stable_mosaic.version = 11 : i64} {
  func.func @kernel(%arg0: i32, %arg1: memref<1x1xf32, #tpu.memory_space<smem>>, %arg2: memref<16x32xf32, #tpu.memory_space<vmem>>, %arg3: memref<32x128xf32, #tpu.memory_space<vmem>>, %arg4: memref<1x128xf32, #tpu.memory_space<vmem>>, %arg5: memref<128x32xf32, #tpu.memory_space<vmem>>, %arg6: memref<1x32xf32, #tpu.memory_space<vmem>>, %arg7: memref<16x32xf32, #tpu.memory_space<vmem>>) attributes {dimension_semantics = [#tpu.dimension_semantics<parallel>], iteration_bounds = array<i64: 1>, scalar_prefetch = 0 : i64, scratch_operands = 0 : i64, tpu.core_type = #tpu.core_type<tc>, window_params = [{transform_indices = @transform_0, window_bounds = array<i64: 1, 1>}, {transform_indices = @transform_1, window_bounds = array<i64: 16, 32>}, {pipeline_mode = #tpu.pipeline_mode<synchronous>, transform_indices = @transform_2, window_bounds = array<i64: 32, 128>}, {pipeline_mode = #tpu.pipeline_mode<synchronous>, transform_indices = @transform_3, window_bounds = array<i64: 1, 128>}, {pipeline_mode = #tpu.pipeline_mode<synchronous>, transform_indices = @transform_4, window_bounds = array<i64: 128, 32>}, {pipeline_mode = #tpu.pipeline_mode<synchronous>, transform_indices = @transform_5, window_bounds = array<i64: 1, 32>}, {transform_indices = @transform_6, window_bounds = array<i64: 16, 32>}]} {
    %c0 = arith.constant 0 : index
    %c0_0 = arith.constant 0 : index
    %0 = vector.load %arg2[%c0, %c0_0] : memref<16x32xf32, #tpu.memory_space<vmem>>, vector<16x32xf32>
    %c0_1 = arith.constant 0 : index
    %c0_2 = arith.constant 0 : index
    %1 = vector.load %arg3[%c0_1, %c0_2] : memref<32x128xf32, #tpu.memory_space<vmem>>, vector<32x128xf32>
    %cst = arith.constant dense<0.000000e+00> : vector<16x128xf32>
    %2 = tpu.matmul %0, %1, %cst {dimension_numbers = #tpu.dot_dimension_numbers<[1], [0], [0], [1], [0, 0, 1, 1], [], []>} : vector<16x32xf32>, vector<32x128xf32>, vector<16x128xf32> -> vector<16x128xf32>
    %c0_3 = arith.constant 0 : index
    %c0_4 = arith.constant 0 : index
    %3 = vector.load %arg4[%c0_3, %c0_4] : memref<1x128xf32, #tpu.memory_space<vmem>>, vector<1x128xf32>
    %4 = vector.broadcast %3 : vector<1x128xf32> to vector<16x128xf32>
    %5 = arith.addf %2, %4 : vector<16x128xf32>
    %cst_5 = arith.constant 5.000000e-01 : f32
    %6 = vector.broadcast %cst_5 : f32 to vector<16x128xf32>
    %7 = arith.mulf %6, %5 : vector<16x128xf32>
    %cst_6 = arith.constant 0.707106769 : f32
    %8 = vector.broadcast %cst_6 : f32 to vector<16x128xf32>
    %9 = arith.mulf %5, %8 : vector<16x128xf32>
    %10 = math.erf %9 : vector<16x128xf32>
    %cst_7 = arith.constant 1.000000e+00 : f32
    %11 = vector.broadcast %cst_7 : f32 to vector<16x128xf32>
    %12 = arith.addf %11, %10 : vector<16x128xf32>
    %13 = arith.mulf %7, %12 : vector<16x128xf32>
    %c0_8 = arith.constant 0 : index
    %c0_9 = arith.constant 0 : index
    %14 = vector.load %arg5[%c0_8, %c0_9] : memref<128x32xf32, #tpu.memory_space<vmem>>, vector<128x32xf32>
    %cst_10 = arith.constant dense<0.000000e+00> : vector<16x32xf32>
    %15 = tpu.matmul %13, %14, %cst_10 {dimension_numbers = #tpu.dot_dimension_numbers<[1], [0], [0], [1], [0, 0, 1, 1], [], []>} : vector<16x128xf32>, vector<128x32xf32>, vector<16x32xf32> -> vector<16x32xf32>
    %c0_11 = arith.constant 0 : index
    %c0_12 = arith.constant 0 : index
    %16 = vector.load %arg6[%c0_11, %c0_12] : memref<1x32xf32, #tpu.memory_space<vmem>>, vector<1x32xf32>
    %17 = vector.broadcast %16 : vector<1x32xf32> to vector<16x32xf32>
    %18 = arith.addf %15, %17 : vector<16x32xf32>
    %c0_13 = arith.constant 0 : index
    %c0_14 = arith.constant 0 : index
    %19 = memref.load %arg1[%c0_13, %c0_14] : memref<1x1xf32, #tpu.memory_space<smem>>
    %20 = vector.broadcast %19 : f32 to vector<16x32xf32>
    %21 = arith.mulf %20, %18 : vector<16x32xf32>
    %22 = arith.addf %0, %21 : vector<16x32xf32>
    %c0_15 = arith.constant 0 : index
    %c0_16 = arith.constant 0 : index
    %23 = vector.load %arg7[%c0_15, %c0_16] : memref<16x32xf32, #tpu.memory_space<vmem>>, vector<16x32xf32>
    tpu.vector_store %arg7[%c0_15, %c0_16], %22 {strides = array<i32>} : memref<16x32xf32, #tpu.memory_space<vmem>>, vector<16x32xf32>,
    return
  }
  func.func @transform_0(%arg0: i32) -> (i32, i32) {
    %c0_i32 = arith.constant 0 : i32
    %c0_i32_0 = arith.constant 0 : i32
    %c0_i32_1 = arith.constant 0 : i32
    return %c0_i32, %c0_i32_0 : i32, i32
  }
  func.func @transform_1(%arg0: i32) -> (i32, i32) {
    %c0_i32 = arith.constant 0 : i32
    %c0_i32_0 = arith.constant 0 : i32
    return %arg0, %c0_i32 : i32, i32
  }
  func.func @transform_2(%arg0: i32) -> (i32, i32) {
    %c0_i32 = arith.constant 0 : i32
    %c0_i32_0 = arith.constant 0 : i32
    %c0_i32_1 = arith.constant 0 : i32
    return %c0_i32, %c0_i32_0 : i32, i32
  }
  func.func @transform_3(%arg0: i32) -> (i32, i32) {
    %c0_i32 = arith.constant 0 : i32
    %c0_i32_0 = arith.constant 0 : i32
    %c0_i32_1 = arith.constant 0 : i32
    return %c0_i32, %c0_i32_0 : i32, i32
  }
  func.func @transform_4(%arg0: i32) -> (i32, i32) {
    %c0_i32 = arith.constant 0 : i32
    %c0_i32_0 = arith.constant 0 : i32
    %c0_i32_1 = arith.constant 0 : i32
    return %c0_i32, %c0_i32_0 : i32, i32
  }
  func.func @transform_5(%arg0: i32) -> (i32, i32) {
    %c0_i32 = arith.constant 0 : i32
    %c0_i32_0 = arith.constant 0 : i32
    %c0_i32_1 = arith.constant 0 : i32
    return %c0_i32, %c0_i32_0 : i32, i32
  }
  func.func @transform_6(%arg0: i32) -> (i32, i32) {
    %c0_i32 = arith.constant 0 : i32
    %c0_i32_0 = arith.constant 0 : i32
    return %arg0, %c0_i32 : i32, i32
  }
}

</mosaic_0001>

<bundles_post_ra>
// kernel: tpu_custom_call.1
= control target key start
LH: loop header
LB: loop body
LE: loop exit
PB: predicated region body
PF: predicated region fallthrough
CT: control target
= control target key end

     0   :  { %s435_s0 = inlined_call_operand.<no memory space> [shape: f32[1,1], index: 0, kind: input, shape index: {}]   ;;  %s436_s1 = inlined_call_operand.vmem [shape: f32[16,32], index: 1, kind: input, shape index: {}]   ;;  %s437_s2 = inlined_call_operand.vmem [shape: f32[32,128], index: 2, kind: input, shape index: {}]   ;;  %s438_s3 = inlined_call_operand.vmem [shape: f32[1,128], index: 3, kind: input, shape index: {}]   ;;  %s439_s4 = inlined_call_operand.vmem [shape: f32[128,32], index: 4, kind: input, shape index: {}]   ;;  %s440_s5 = inlined_call_operand.vmem [shape: f32[1,32], index: 5, kind: input, shape index: {}]   ;;  %s441_s6 = inlined_call_operand.hbm [shape: f32[16,32], index: 6, kind: output, shape index: {}]  }
   0x1   :  { %v30_v0 = vld [vmem:[%s437_s2 + $0x18] sm:$0xff]  ;;  %v29_v1 = vld [vmem:[%s437_s2 + $0x10] sm:$0xff]  ;;  %v28_v2 = vld [vmem:[%s437_s2 + $0x8] sm:$0xff] }
   0x2   :  { %54 = vmatpush.msra.mxu0 %v30_v0 }
   0x4   :  { %55 = vmatpush.msra.mxu0 %v29_v1 }
   0x5   :  { %12 = vsyncpa [#allocation4], 0  ;;  %v27_v3 = vld [vmem:[%s437_s2] sm:$0xff]  ;;  %vm35_vm0 = vcmask 261120   ;;  %v337_v5 = vld [vmem:[%s436_s1 + $0x8] sm:$0xff]  ;;  %s277_s17 = smov [#allocation3]  }
   0x6   :  { %56 = vmatpush.msra.mxu0 %v28_v2  ;;  %v330_v4 = vld [vmem:[%s436_s1] sm:$0xff]  ;;  %v168_v6 = vld [vmem:[%s439_s4 + $0x78] sm:$0xff]  ;;  %v167_v7 = vld [vmem:[%s439_s4 + $0x70] sm:$0xff]  ;;  %s208_s18 = sshll.u32 %s277_s17, 4  ;;  %s210_s21 = sshll.u32 %s441_s6, 4  ;;  %s209_s18 = int_to_ptr.vmem [resolvable:$true] %s208_s18  ;;  %s211_s21 = int_to_ptr.hbm [resolvable:$true] %s210_s21 }
   0x7   :  { %173 = vmatpush.msra.mxu1 %v168_v6  ;;  %226 = vmatpush.msra.mxu2 %v168_v6  ;;  %v166_v8 = vld [vmem:[%s439_s4 + $0x68] sm:$0xff]  ;;  %v165_v9 = vld [vmem:[%s439_s4 + $0x60] sm:$0xff]  ;;  %v164_v11 = vld [vmem:[%s439_s4 + $0x58] sm:$0xff] }
   0x8   :  { %57 = vmatpush.msra.mxu0 %v27_v3  ;;  %v245_v10 = vld [vmem:[%s438_s3] ss:$0 sm:$0xff]  ;;  %v163_v13 = vld [vmem:[%s439_s4 + $0x50] sm:$0xff]  ;;  %v162_v15 = vld [vmem:[%s439_s4 + $0x48] sm:$0xff] }
   0x9   :  { %222 = vmatmul.msk.f32.vlgmr.msra.gmra.mxu0 %vm35_vm0, %v330_v4  ;;  %174 = vmatpush.msra.mxu1 %v167_v7  ;;  %v161_v17 = vld [vmem:[%s439_s4 + $0x40] sm:$0xff]  ;;  %v160_v19 = vld [vmem:[%s439_s4 + $0x38] sm:$0xff]  ;;  %v159_v20 = vld [vmem:[%s439_s4 + $0x30] sm:$0xff] }
   0xa   :  { %227 = vmatpush.msra.mxu2 %v167_v7  ;;  %v158_v23 = vld [vmem:[%s439_s4 + $0x28] sm:$0xff]  ;;  %v157_v27 = vld [vmem:[%s439_s4 + $0x20] sm:$0xff]  ;;  %v156_v30 = vld [vmem:[%s439_s4 + $0x18] sm:$0xff] }
   0xb   :  { %175 = vmatpush.msra.mxu1 %v166_v8  ;;  %v155_v34 = vld [vmem:[%s439_s4 + $0x10] sm:$0xff]  ;;  %v154_v37 = vld [vmem:[%s439_s4 + $0x8] sm:$0xff]  ;;  %v153_v42 = vld [vmem:[%s439_s4] sm:$0xff] }
   0xc   :  { %228 = vmatpush.msra.mxu2 %v166_v8 }
   0xd   :  { %176 = vmatpush.msra.mxu1 %v165_v9 }
   0xe   :  { %229 = vmatpush.msra.mxu2 %v165_v9 }
   0xf   :  { %177 = vmatpush.msra.mxu1 %v164_v11 }
  0x10   :  { %230 = vmatpush.msra.mxu2 %v164_v11 }
  0x11   :  { %223 = vmatmul.msk.f32.gmra.mxu0 %vm35_vm0, %v337_v5  ;;  %178 = vmatpush.msra.mxu1 %v163_v13 }
  0x12   :  { %231 = vmatpush.msra.mxu2 %v163_v13 }
  0x13   :  { %179 = vmatpush.msra.mxu1 %v162_v15 }
  0x14   :  { %232 = vmatpush.msra.mxu2 %v162_v15 }
  0x15   :  { %180 = vmatpush.msra.mxu1 %v161_v17 }
  0x16   :  { %233 = vmatpush.msra.mxu2 %v161_v17 }
  0x17   :  { %181 = vmatpush.msra.mxu1 %v160_v19 }
  0x18   :  { %234 = vmatpush.msra.mxu2 %v160_v19 }
  0x19   :  { %182 = vmatpush.msra.mxu1 %v159_v20 }
  0x1a   :  { %235 = vmatpush.msra.mxu2 %v159_v20 }
  0x1b   :  { %183 = vmatpush.msra.mxu1 %v158_v23 }
  0x1c   :  { %236 = vmatpush.msra.mxu2 %v158_v23 }
  0x1d   :  { %184 = vmatpush.msra.mxu1 %v157_v27 }
  0x1e   :  { %237 = vmatpush.msra.mxu2 %v157_v27 }
  0x1f   :  { %185 = vmatpush.msra.mxu1 %v156_v30 }
  0x20   :  { %238 = vmatpush.msra.mxu2 %v156_v30 }
  0x21   :  { %186 = vmatpush.msra.mxu1 %v155_v34 }
  0x22   :  { %239 = vmatpush.msra.mxu2 %v155_v34 }
  0x23   :  { %187 = vmatpush.msra.mxu1 %v154_v37 }
  0x24   :  { %240 = vmatpush.msra.mxu2 %v154_v37 }
  0x25   :  { %188 = vmatpush.msra.mxu1 %v153_v42 }
  0x26   :  { %241 = vmatpush.msra.mxu2 %v153_v42 }
  0x86   :  { %v59_v12 = vpop.f32.mrf.mxu0 }
  0x87   :  { %v362_v14 = vadd.f32 %v245_v10, %v59_v12 }
  0x89   :  { %v368_v16 = vmul.f32 0.70710677, %v362_v14 }
  0x8b   :  { %v69_v18 = vmul.f32 %v368_v16, %v368_v16 }
  0x8d   :  { %v381_v21 = vmin.f32 %v69_v18, 16.0 }
  0x8e   :  { %v62_v22 = vpop.f32.mrf.mxu0 }
  0x8f   :  { %v71_v24 = vmul.f32 2.1237322e-06, %v381_v21  ;;  %v387_v25 = vadd.f32 %v245_v10, %v62_v22  ;;  %v82_v26 = vmul.f32 3.8918573e-05, %v381_v21 }
  0x91   :  { %v72_v28 = vadd.f32 0.00028619796, %v71_v24  ;;  %v394_v29 = vmul.f32 0.70710677, %v387_v25  ;;  %v83_v31 = vadd.f32 0.001143296, %v82_v26 }
  0x93   :  { %v73_v32 = vmul.f32 %v72_v28, %v381_v21  ;;  %v109_v33 = vmul.f32 %v394_v29, %v394_v29  ;;  %v84_v35 = vmul.f32 %v83_v31, %v381_v21 }
  0x95   :  { %v110_v36 = vmin.f32 %v109_v33, 16.0  ;;  %v85_v38 = vadd.f32 0.014752088, %v84_v35  ;;  %v74_v39 = vadd.f32 0.0036580483, %v73_v32  ;;  %v65_v35 = vmul.f32 0.5, %v362_v14 }
  0x96   :  { %v246_v14 = vld [vmem:[%s440_s5] ss:$0 sm:$0xff]  ;;  %s279_s5 = smov 8  }
  0x97   :  { %v111_v40 = vmul.f32 2.1237322e-06, %v110_v36  ;;  %v122_v41 = vmul.f32 3.8918573e-05, %v110_v36  ;;  %v86_v43 = vmul.f32 %v85_v38, %v381_v21  ;;  %v75_v47 = vmul.f32 %v74_v39, %v381_v21 }
  0x99   :  { %v112_v44 = vadd.f32 0.00028619796, %v111_v40  ;;  %v123_v45 = vadd.f32 0.001143296, %v122_v41  ;;  %v87_v46 = vadd.f32 0.112945676, %v86_v43 }
  0x9a   :  { %v76_v54 = vadd.f32 0.05243302, %v75_v47  ;;  %v66_v43 = vmul.f32 0.5, %v387_v25 }
  0x9b   :  { %v113_v48 = vmul.f32 %v112_v44, %v110_v36  ;;  %v124_v49 = vmul.f32 %v123_v45, %v110_v36  ;;  %v88_v50 = vmul.f32 %v87_v46, %v381_v21 }
  0x9c   :  { %v77_v60 = vmul.f32 %v76_v54, %v381_v21 }
  0x9d   :  { %v125_v51 = vadd.f32 0.014752088, %v124_v49  ;;  %v114_v52 = vadd.f32 0.0036580483, %v113_v48  ;;  %v89_v53 = vadd.f32 0.4994258, %v88_v50 }
  0x9e   :  { %v78_v0 = vadd.f32 0.18741608, %v77_v60 }
  0x9f   :  { %v126_v55 = vmul.f32 %v125_v51, %v110_v36  ;;  %v90_v56 = vmul.f32 %v89_v53, %v381_v21  ;;  %v115_v58 = vmul.f32 %v114_v52, %v110_v36 }
  0xa0   :  { %v79_v7 = vmul.f32 %v78_v0, %v381_v21 }
  0xa1   :  { %v127_v57 = vadd.f32 0.112945676, %v126_v55  ;;  %v91_v59 = vadd.f32 1.0, %v90_v56  ;;  %v116_v63 = vadd.f32 0.05243302, %v115_v58 }
  0xa2   :  { %v80_v12 = vadd.f32 1.1283791, %v79_v7 }
  0xa3   :  { %v128_v61 = vmul.f32 %v127_v57, %v110_v36  ;;  %247 = vrcp.f32 %v91_v59  ;;  %v117_v6 = vmul.f32 %v116_v63, %v110_v36  ;;  %v103_v11 = vand.u32 2147483648, %v91_v59 }
  0xa4   :  { %v101_v15 = vand.u32 2147483647, %v91_v59  ;;  %vm97_vm2 = vweird.f32 %v91_v59  ;;  %v81_v23 = vmul.f32 %v80_v12, %v368_v16 }
  0xa5   :  { %v129_v62 = vadd.f32 0.4994258, %v128_v61  ;;  %v118_v10 = vadd.f32 0.18741608, %v117_v6  ;;  %v104_v20 = vor.u32 1.1754944e-38, %v103_v11 }
  0xa6   :  { %vm102_vm4 = vcmp.eq.f32.partialorder %v101_v15, 8.507059e+37 }
  0xa7   :  { %v130_v1 = vmul.f32 %v129_v62, %v110_v36  ;;  %v119_v19 = vmul.f32 %v118_v10, %v110_v36 }
  0xa9   :  { %v131_v2 = vadd.f32 1.0, %v130_v1  ;;  %v248_v3 = vpop.eup %247  ;;  %v120_v30 = vadd.f32 1.1283791, %v119_v19 }
  0xaa   :  { %v93_v8 = vmul.f32 %v248_v3, %v91_v59  ;;  %vm98_vm1 = vweird.f32 %v248_v3 }
  0xab   :  { %249 = vrcp.f32 %v131_v2  ;;  %vm99_vm3 = vmor %vm97_vm2, %vm98_vm1  ;;  %v143_v28 = vand.u32 2147483648, %v131_v2  ;;  %v141_v32 = vand.u32 2147483647, %v131_v2  ;;  %vm137_vm6 = vweird.f32 %v131_v2 }
  0xac   :  { %v94_v9 = vsub.f32 1.0, %v93_v8  ;;  %v121_v16 = vmul.f32 %v120_v30, %v394_v29  ;;  %v197_v29 = vstv %s435_s0  ;;  %s278_s0 = smov 128  }
  0xad   :  { %v144_v37 = vor.u32 1.1754944e-38, %v143_v28  ;;  %vm142_vm8 = vcmp.eq.f32.partialorder %v141_v32, 8.507059e+37 }
  0xae   :  { %v95_v13 = vmul.f32 %v248_v3, %v94_v9 }
  0xb0   :  { %v96_v18 = vadd.f32 %v248_v3, %v95_v13 }
  0xb1   :  { %v250_v17 = vpop.eup %249 }
  0xb2   :  { %v133_v22 = vmul.f32 %v250_v17, %v131_v2  ;;  %v100_v24 = vsel %vm99_vm3, %v248_v3, %v96_v18  ;;  %vm138_vm5 = vweird.f32 %v250_v17 }
  0xb3   :  { %v105_v21 = vsel %vm102_vm4, %v104_v20, %v100_v24  ;;  %vm139_vm7 = vmor %vm137_vm6, %vm138_vm5 }
  0xb4   :  { %v134_v26 = vsub.f32 1.0, %v133_v22  ;;  %v106_v27 = vmul.f32 %v105_v21, %v81_v23 }
  0xb6   :  { %v135_v31 = vmul.f32 %v250_v17, %v134_v26  ;;  %v224_v33 = vclamps-f32 %v106_v27, 1.0 }
  0xb8   :  { %v136_v34 = vadd.f32 %v250_v17, %v135_v31  ;;  %v149_v36 = vadd.f32 1.0, %v224_v33 }
  0xba   :  { %v140_v38 = vsel %vm139_vm7, %v250_v17, %v136_v34  ;;  %v151_v39 = vmul.f32 %v149_v36, %v65_v35 }
  0xbb   :  { %v145_v40 = vsel %vm142_vm8, %v144_v37, %v140_v38 }
  0xbc   :  { %v146_v41 = vmul.f32 %v145_v40, %v121_v16  ;;  %189 = vmatmul.f32.vlgmr.msra.gmra.mxu1 %v151_v39 }
  0xbe   :  { %v225_v42 = vclamps-f32 %v146_v41, 1.0 }
  0xc0   :  { %v150_v44 = vadd.f32 1.0, %v225_v42 }
  0xc2   :  { %v152_v45 = vmul.f32 %v150_v44, %v66_v43 }
  0xc4   :  { %192 = vmatmul.f32.vlgmr.msra.gmra.mxu2 %v152_v45 }
 0x139   :  { %v190_v46 = vpop.f32.mrf.mxu1 }
 0x13a   :  { %v191_v47 = vadd.f32 %v246_v14, %v190_v46 }
 0x13c   :  { %v198_v48 = vmul.f32 %v197_v29, %v191_v47 }
 0x13e   :  { %v200_v49 = vadd.f32 %v198_v48, %v330_v4 }
 0x140   :  { %202 = vst.msk [vmem:[#allocation3] sm:$0xff] %vm35_vm0, %v200_v49 }
 0x147   :  { %v193_v50 = vpop.f32.mrf.mxu2 }
 0x148   :  { %v194_v25 = vadd.f32 %v246_v14, %v193_v50 }
 0x14a   :  { %v199_v51 = vmul.f32 %v197_v29, %v194_v25 }
 0x14c   :  { %v201_v52 = vadd.f32 %v199_v51, %v337_v5 }
 0x14e   :  { %203 = vst.msk [vmem:[#allocation3 + $0x8] sm:$0xff] %vm35_vm0, %v201_v52 }
 0x14f   :  { %216 = dma.vmem_to_hbm [thread:$0]  %s209_s18, 256, %s211_s21, [#allocation4], %s278_s0, %s278_s0, %s279_s5  }
 0x150   :  { %275 = dma.done.wait [#allocation4], 256  }
 0x151   :  { %276 = vsyncadd [#allocation4], 4294967040 }
 0x152   :  { %221 = vsyncpa [#allocation4], 1 }

</bundles_post_ra>
